<compile_context>
chip_gen: v5e
topology: v5e:2x2
jax: 0.10.0
libtpu: 0.0.40
codegen_flags: <defaults>
</compile_context>

<pallas_src>
import functools

import jax
import jax.numpy as jnp
from jax.experimental import pallas as pl
from jax.experimental.pallas import tpu as pltpu

BN_EPS = 1e-5


# ---------------------------------------------------------------------------
# Fused kernel
# ---------------------------------------------------------------------------
def _generator_kernel(*refs, gen_dims, embedding_dim):
    """Fused Residual-stack + interleaved final Linear.

    refs layout:
      [x, W_0..W_{K-1}, gb_all, final_w, final_b,   # inputs
       out,                                         # output
       act]                                         # VMEM scratch (B, final_dim) bf16
    """
    K = len(gen_dims)
    x_ref = refs[0]
    w_refs = refs[1:1 + K]
    gb_ref = refs[1 + K]          # (2, sum(gen_dims)) f32: row0=gamma, row1=beta
    wf_ref = refs[2 + K]          # (final_dim, data_dim) bf16
    bf_ref = refs[3 + K]          # (1, data_dim) f32
    out_ref = refs[4 + K]
    act_ref = refs[5 + K]         # (B, final_dim) bf16 scratch

    final_dim = embedding_dim + sum(gen_dims)
    batch = x_ref.shape[0]
    inv_b = jnp.float32(1.0 / batch)

    # Original input occupies the rightmost `embedding_dim` columns; the live region
    # is act[:, start:final_dim] and grows leftward block by block (torch.cat puts the
    # new features FIRST, so no re-copies are ever needed).
    start = final_dim - embedding_dim
    x_bf = x_ref[...].astype(jnp.bfloat16)
    act_ref[:, start:final_dim] = x_bf

    # Interleaved final Linear: contribution of the original input + bias.
    y = jnp.dot(x_bf, wf_ref[start:final_dim, :],
                preferred_element_type=jnp.float32) + bf_ref[...]

    goff = 0
    for k, o_dim in enumerate(gen_dims):
        live = act_ref[:, start:final_dim]                 # (B, cur_dim) bf16, static slice
        h = jnp.dot(live, w_refs[k][...], preferred_element_type=jnp.float32)

        # BatchNorm1d, training mode (batch statistics, biased variance, eps=1e-5).
        # The Linear bias is exactly cancelled by the batch-mean subtraction, so it is
        # never added; the BN affine is folded into a single scale/shift.
        mean = jnp.sum(h, axis=0, keepdims=True) * inv_b
        mean_sq = jnp.sum(h * h, axis=0, keepdims=True) * inv_b
        var = jnp.maximum(mean_sq - mean * mean, 0.0)
        g = gb_ref[0:1, goff:goff + o_dim]
        be = gb_ref[1:2, goff:goff + o_dim]
        s = g * jax.lax.rsqrt(var + BN_EPS)                # (1, O)
        t = be - mean * s                                  # (1, O)
        h_bf = jnp.maximum(h * s + t, 0.0).astype(jnp.bfloat16)

        start -= o_dim
        goff += o_dim
        # concat([h, live]) == store only the new features just left of the live region.
        # The last block's output feeds nothing but the final Linear, so skip its store.
        if k < K - 1:
            act_ref[:, start:start + o_dim] = h_bf

        # Interleaved final-Linear partial for this block's feature segment.
        y = y + jnp.dot(h_bf, wf_ref[start:start + o_dim, :],
                        preferred_element_type=jnp.float32)

    out_ref[...] = y.astype(out_ref.dtype)
    # TODO(synk): BatchNorm1d running_mean/var buffer updates (training-mode side effect
    # of the PyTorch module) are not materialized; the forward output does not depend
    # on them.


def _vmem_capacity_bytes(default=64 << 20):
    try:
        cap = getattr(pltpu.get_tpu_info(), "vmem_capacity_bytes", None)
        if cap:
            return int(cap)
    except Exception:
        pass
    return default


# ---------------------------------------------------------------------------
# Wrapper (single pallas_call for the whole generator)
# ---------------------------------------------------------------------------
def generator_forward(params, x):
    residuals = params["residuals"]
    gen_dims = tuple(int(p["w"].shape[1]) for p in residuals)
    embedding_dim = int(x.shape[1])
    data_dim = int(params["final_w"].shape[1])
    final_dim = embedding_dim + sum(gen_dims)
    batch = int(x.shape[0])

    # Matmul operands go to the MXU in bf16 (f32 accumulation inside the kernel);
    # BN parameters and the final bias stay f32.  gamma/beta of all blocks are packed
    # into one (2, sum(gen_dims)) operand.  The per-block Linear bias is not passed at
    # all: BN's batch-mean subtraction cancels it exactly.
    args = [x]
    for p in residuals:
        args.append(p["w"].astype(jnp.bfloat16))
    gb_all = jnp.concatenate(
        [jnp.concatenate([p["gamma"] for p in residuals], axis=1),
         jnp.concatenate([p["beta"] for p in residuals], axis=1)], axis=0)
    args.append(gb_all)
    args.append(params["final_w"].astype(jnp.bfloat16))
    args.append(params["final_b"])

    # Cost hint for XLA scheduling around the custom call.
    flops = 0
    dim = embedding_dim
    for o in gen_dims:
        flops += 2 * batch * dim * o + 6 * batch * o       # block matmul + folded BN/ReLU
        flops += 2 * batch * o * data_dim                  # interleaved final-Linear partial
        dim += o
    flops += 2 * batch * embedding_dim * data_dim          # input's final-Linear partial
    transcendentals = sum(gen_dims)                        # one rsqrt per BN feature
    bytes_in = sum(int(a.size) * a.dtype.itemsize for a in args)
    bytes_out = batch * data_dim * 4
    cost = pl.CostEstimate(flops=int(flops),
                           transcendentals=int(transcendentals),
                           bytes_accessed=int(bytes_in + bytes_out))

    # Everything (bf16 weights + bf16 growing activation) is VMEM-resident.  Derive the
    # scoped-VMEM cap from the actual chip generation (128 MiB on v5e/v6e, 64 MiB per TC
    # on v7x) with ~8 MiB headroom for compiler-internal scratch.
    scratch_bytes = batch * final_dim * 2
    needed = bytes_in + bytes_out + scratch_bytes
    vmem_cap = _vmem_capacity_bytes()
    vmem_limit = int(min(max(2 * needed + (2 << 20), 32 << 20), vmem_cap - (8 << 20)))
    # TODO(synk): for models whose weights no longer fit the cap (notably v7x's 64 MiB),
    # move final_w / large block weights to memory_space=pl.ANY and double-buffer their
    # tiles with pltpu.make_async_copy instead of keeping them fully VMEM-resident.

    vmem = pl.BlockSpec(memory_space=pltpu.MemorySpace.VMEM)
    kernel = functools.partial(_generator_kernel,
                               gen_dims=gen_dims,
                               embedding_dim=embedding_dim)
    return pl.pallas_call(
        kernel,
        out_shape=jax.ShapeDtypeStruct((batch, data_dim), jnp.float32),
        in_specs=[vmem] * len(args),
        out_specs=vmem,
        scratch_shapes=[pltpu.VMEM((batch, final_dim), jnp.bfloat16)],
        compiler_params=pltpu.CompilerParams(vmem_limit_bytes=vmem_limit),
        cost_estimate=cost,
    )(*args)


# ---------------------------------------------------------------------------
# Parameter construction (deterministic; mirrors module __init__ shapes)
# ---------------------------------------------------------------------------
def init_generator_params(key, embedding_dim, gen_dims, data_dim):
    params = {"residuals": []}
    dim = embedding_dim
    for item in list(gen_dims):
        key, kw, kb = jax.random.split(key, 3)
        bound = 1.0 / jnp.sqrt(jnp.float32(dim))
        w = jax.random.uniform(kw, (dim, item), jnp.float32, -bound, bound)
        b = jax.random.uniform(kb, (1, item), jnp.float32, -bound, bound)
        gamma = jnp.ones((1, item), jnp.float32)   # BatchNorm1d default weight
        beta = jnp.zeros((1, item), jnp.float32)   # BatchNorm1d default bias
        params["residuals"].append({"w": w, "b": b, "gamma": gamma, "beta": beta})
        dim += item
    key, kw, kb = jax.random.split(key, 3)
    bound = 1.0 / jnp.sqrt(jnp.float32(dim))
    params["final_w"] = jax.random.uniform(kw, (dim, data_dim), jnp.float32, -bound, bound)
    params["final_b"] = jax.random.uniform(kb, (1, data_dim), jnp.float32, -bound, bound)
    return params


# Pure-JAX f32 reference (two-pass BN stats, explicit bias add — same math as PyTorch).
def generator_forward_ref(params, x):
    h = x
    for p in params["residuals"]:
        lin = h @ p["w"] + p["b"]
        mean = jnp.mean(lin, axis=0, keepdims=True)
        var = jnp.mean((lin - mean) ** 2, axis=0, keepdims=True)
        bn = (lin - mean) * jax.lax.rsqrt(var + BN_EPS) * p["gamma"] + p["beta"]
        h = jnp.concatenate([jnp.maximum(bn, 0.0), h], axis=1)
    return h @ params["final_w"] + params["final_b"]


if __name__ == "__main__":
    # Feature widths are multiples of 128 so every concat segment starts on a lane
    # boundary (lane-dense stores, aligned MXU / final-Linear row tiles); 256-wide
    # segments fill v6e/v7x MXU columns.  batch=16 keeps full-batch BN statistics
    # inside one kernel invocation.
    batch = 16
    embedding_dim = 128
    gen_dims = (256, 128)
    data_dim = 256

    key = jax.random.PRNGKey(0)
    key, kx, kp = jax.random.split(key, 3)
    x = jax.random.normal(kx, (batch, embedding_dim), jnp.float32)
    params = init_generator_params(kp, embedding_dim, gen_dims, data_dim)

    out = jax.block_until_ready(generator_forward(params, x))

    ref = generator_forward_ref(params, x)
    assert out.shape == (batch, data_dim), out.shape
    max_err = float(jnp.max(jnp.abs(out - ref)))
    # bf16 MXU operands -> relaxed tolerance vs. the f32 reference.
    assert jnp.allclose(out, ref, atol=2e-2, rtol=2e-2), max_err

    print("KERNEL_OK")
</pallas_src>

<mosaic_0001>
module attributes {stable_mosaic.version = 11 : i64} {
  func.func @_generator_kernel(%arg0: memref<16x128xf32, #tpu.memory_space<vmem>>, %arg1: memref<128x256xbf16, #tpu.memory_space<vmem>>, %arg2: memref<384x128xbf16, #tpu.memory_space<vmem>>, %arg3: memref<2x384xf32, #tpu.memory_space<vmem>>, %arg4: memref<512x256xbf16, #tpu.memory_space<vmem>>, %arg5: memref<1x256xf32, #tpu.memory_space<vmem>>, %arg6: memref<16x256xf32, #tpu.memory_space<vmem>>, %arg7: memref<16x512xbf16, #tpu.memory_space<vmem>>) attributes {dimension_semantics = [], scalar_prefetch = 0 : i64, scratch_operands = 1 : i64, tpu.core_type = #tpu.core_type<tc>} {
    %c0 = arith.constant 0 : index
    %c0_0 = arith.constant 0 : index
    %0 = vector.load %arg0[%c0, %c0_0] : memref<16x128xf32, #tpu.memory_space<vmem>>, vector<16x128xf32>
    %1 = arith.truncf %0 : vector<16x128xf32> to vector<16x128xbf16>
    %c0_1 = arith.constant 0 : index
    %c384 = arith.constant 384 : index
    %2 = vector.load %arg7[%c0_1, %c384] : memref<16x512xbf16, #tpu.memory_space<vmem>>, vector<16x128xbf16>
    tpu.vector_store %arg7[%c0_1, %c384], %1 {strides = array<i32>} : memref<16x512xbf16, #tpu.memory_space<vmem>>, vector<16x128xbf16>,
    %c384_2 = arith.constant 384 : index
    %c0_3 = arith.constant 0 : index
    %3 = vector.load %arg4[%c384_2, %c0_3] : memref<512x256xbf16, #tpu.memory_space<vmem>>, vector<128x256xbf16>
    %cst = arith.constant dense<0.000000e+00> : vector<16x256xf32>
    %4 = tpu.matmul %1, %3, %cst {dimension_numbers = #tpu.dot_dimension_numbers<[1], [0], [0], [1], [0, 0, 1, 1], [], []>} : vector<16x128xbf16>, vector<128x256xbf16>, vector<16x256xf32> -> vector<16x256xf32>
    %c0_4 = arith.constant 0 : index
    %c0_5 = arith.constant 0 : index
    %5 = vector.load %arg5[%c0_4, %c0_5] : memref<1x256xf32, #tpu.memory_space<vmem>>, vector<1x256xf32>
    %6 = vector.broadcast %5 : vector<1x256xf32> to vector<16x256xf32>
    %7 = arith.addf %4, %6 : vector<16x256xf32>
    %c0_6 = arith.constant 0 : index
    %c384_7 = arith.constant 384 : index
    %8 = vector.load %arg7[%c0_6, %c384_7] : memref<16x512xbf16, #tpu.memory_space<vmem>>, vector<16x128xbf16>
    %c0_8 = arith.constant 0 : index
    %c0_9 = arith.constant 0 : index
    %9 = vector.load %arg1[%c0_8, %c0_9] : memref<128x256xbf16, #tpu.memory_space<vmem>>, vector<128x256xbf16>
    %cst_10 = arith.constant dense<0.000000e+00> : vector<16x256xf32>
    %10 = tpu.matmul %8, %9, %cst_10 {dimension_numbers = #tpu.dot_dimension_numbers<[1], [0], [0], [1], [0, 0, 1, 1], [], []>} : vector<16x128xbf16>, vector<128x256xbf16>, vector<16x256xf32> -> vector<16x256xf32>
    %cst_11 = arith.constant dense<0.000000e+00> : vector<256xf32>
    %11 = vector.multi_reduction <add>, %10, %cst_11 [0] : vector<16x256xf32> to vector<256xf32>
    %12 = vector.shape_cast %11 : vector<256xf32> to vector<1x256xf32>
    %cst_12 = arith.constant 6.250000e-02 : f32
    %13 = vector.broadcast %cst_12 : f32 to vector<1x256xf32>
    %14 = arith.mulf %12, %13 : vector<1x256xf32>
    %15 = arith.mulf %10, %10 : vector<16x256xf32>
    %cst_13 = arith.constant dense<0.000000e+00> : vector<256xf32>
    %16 = vector.multi_reduction <add>, %15, %cst_13 [0] : vector<16x256xf32> to vector<256xf32>
    %17 = vector.shape_cast %16 : vector<256xf32> to vector<1x256xf32>
    %cst_14 = arith.constant 6.250000e-02 : f32
    %18 = vector.broadcast %cst_14 : f32 to vector<1x256xf32>
    %19 = arith.mulf %17, %18 : vector<1x256xf32>
    %20 = arith.mulf %14, %14 : vector<1x256xf32>
    %21 = arith.subf %19, %20 : vector<1x256xf32>
    %cst_15 = arith.constant 0.000000e+00 : f32
    %22 = vector.broadcast %cst_15 : f32 to vector<1x256xf32>
    %23 = arith.maximumf %21, %22 : vector<1x256xf32>
    %c0_16 = arith.constant 0 : index
    %c0_17 = arith.constant 0 : index
    %24 = vector.load %arg3[%c0_16, %c0_17] : memref<2x384xf32, #tpu.memory_space<vmem>>, vector<1x256xf32>
    %c1 = arith.constant 1 : index
    %c0_18 = arith.constant 0 : index
    %25 = vector.load %arg3[%c1, %c0_18] : memref<2x384xf32, #tpu.memory_space<vmem>>, vector<1x256xf32>
    %cst_19 = arith.constant 9.99999974E-6 : f32
    %26 = vector.broadcast %cst_19 : f32 to vector<1x256xf32>
    %27 = arith.addf %23, %26 : vector<1x256xf32>
    %28 = math.rsqrt %27 : vector<1x256xf32>
    %29 = arith.mulf %24, %28 : vector<1x256xf32>
    %30 = arith.mulf %14, %29 : vector<1x256xf32>
    %31 = arith.subf %25, %30 : vector<1x256xf32>
    %32 = vector.broadcast %29 : vector<1x256xf32> to vector<16x256xf32>
    %33 = arith.mulf %10, %32 : vector<16x256xf32>
    %34 = vector.broadcast %31 : vector<1x256xf32> to vector<16x256xf32>
    %35 = arith.addf %33, %34 : vector<16x256xf32>
    %cst_20 = arith.constant 0.000000e+00 : f32
    %36 = vector.broadcast %cst_20 : f32 to vector<16x256xf32>
    %37 = arith.maximumf %35, %36 : vector<16x256xf32>
    %38 = arith.truncf %37 : vector<16x256xf32> to vector<16x256xbf16>
    %c0_21 = arith.constant 0 : index
    %c128 = arith.constant 128 : index
    %39 = vector.load %arg7[%c0_21, %c128] : memref<16x512xbf16, #tpu.memory_space<vmem>>, vector<16x256xbf16>
    tpu.vector_store %arg7[%c0_21, %c128], %38 {strides = array<i32>} : memref<16x512xbf16, #tpu.memory_space<vmem>>, vector<16x256xbf16>,
    %c128_22 = arith.constant 128 : index
    %c0_23 = arith.constant 0 : index
    %40 = vector.load %arg4[%c128_22, %c0_23] : memref<512x256xbf16, #tpu.memory_space<vmem>>, vector<256x256xbf16>
    %cst_24 = arith.constant dense<0.000000e+00> : vector<16x256xf32>
    %41 = tpu.matmul %38, %40, %cst_24 {dimension_numbers = #tpu.dot_dimension_numbers<[1], [0], [0], [1], [0, 0, 1, 1], [], []>} : vector<16x256xbf16>, vector<256x256xbf16>, vector<16x256xf32> -> vector<16x256xf32>
    %42 = arith.addf %7, %41 : vector<16x256xf32>
    %c0_25 = arith.constant 0 : index
    %c128_26 = arith.constant 128 : index
    %43 = vector.load %arg7[%c0_25, %c128_26] : memref<16x512xbf16, #tpu.memory_space<vmem>>, vector<16x384xbf16>
    %c0_27 = arith.constant 0 : index
    %c0_28 = arith.constant 0 : index
    %44 = vector.load %arg2[%c0_27, %c0_28] : memref<384x128xbf16, #tpu.memory_space<vmem>>, vector<384x128xbf16>
    %cst_29 = arith.constant dense<0.000000e+00> : vector<16x128xf32>
    %45 = tpu.matmul %43, %44, %cst_29 {dimension_numbers = #tpu.dot_dimension_numbers<[1], [0], [0], [1], [0, 0, 1, 1], [], []>} : vector<16x384xbf16>, vector<384x128xbf16>, vector<16x128xf32> -> vector<16x128xf32>
    %cst_30 = arith.constant dense<0.000000e+00> : vector<128xf32>
    %46 = vector.multi_reduction <add>, %45, %cst_30 [0] : vector<16x128xf32> to vector<128xf32>
    %47 = vector.shape_cast %46 : vector<128xf32> to vector<1x128xf32>
    %cst_31 = arith.constant 6.250000e-02 : f32
    %48 = vector.broadcast %cst_31 : f32 to vector<1x128xf32>
    %49 = arith.mulf %47, %48 : vector<1x128xf32>
    %50 = arith.mulf %45, %45 : vector<16x128xf32>
    %cst_32 = arith.constant dense<0.000000e+00> : vector<128xf32>
    %51 = vector.multi_reduction <add>, %50, %cst_32 [0] : vector<16x128xf32> to vector<128xf32>
    %52 = vector.shape_cast %51 : vector<128xf32> to vector<1x128xf32>
    %cst_33 = arith.constant 6.250000e-02 : f32
    %53 = vector.broadcast %cst_33 : f32 to vector<1x128xf32>
    %54 = arith.mulf %52, %53 : vector<1x128xf32>
    %55 = arith.mulf %49, %49 : vector<1x128xf32>
    %56 = arith.subf %54, %55 : vector<1x128xf32>
    %cst_34 = arith.constant 0.000000e+00 : f32
    %57 = vector.broadcast %cst_34 : f32 to vector<1x128xf32>
    %58 = arith.maximumf %56, %57 : vector<1x128xf32>
    %c0_35 = arith.constant 0 : index
    %c256 = arith.constant 256 : index
    %59 = vector.load %arg3[%c0_35, %c256] : memref<2x384xf32, #tpu.memory_space<vmem>>, vector<1x128xf32>
    %c1_36 = arith.constant 1 : index
    %c256_37 = arith.constant 256 : index
    %60 = vector.load %arg3[%c1_36, %c256_37] : memref<2x384xf32, #tpu.memory_space<vmem>>, vector<1x128xf32>
    %cst_38 = arith.constant 9.99999974E-6 : f32
    %61 = vector.broadcast %cst_38 : f32 to vector<1x128xf32>
    %62 = arith.addf %58, %61 : vector<1x128xf32>
    %63 = math.rsqrt %62 : vector<1x128xf32>
    %64 = arith.mulf %59, %63 : vector<1x128xf32>
    %65 = arith.mulf %49, %64 : vector<1x128xf32>
    %66 = arith.subf %60, %65 : vector<1x128xf32>
    %67 = vector.broadcast %64 : vector<1x128xf32> to vector<16x128xf32>
    %68 = arith.mulf %45, %67 : vector<16x128xf32>
    %69 = vector.broadcast %66 : vector<1x128xf32> to vector<16x128xf32>
    %70 = arith.addf %68, %69 : vector<16x128xf32>
    %cst_39 = arith.constant 0.000000e+00 : f32
    %71 = vector.broadcast %cst_39 : f32 to vector<16x128xf32>
    %72 = arith.maximumf %70, %71 : vector<16x128xf32>
    %73 = arith.truncf %72 : vector<16x128xf32> to vector<16x128xbf16>
    %c0_40 = arith.constant 0 : index
    %c0_41 = arith.constant 0 : index
    %74 = vector.load %arg4[%c0_40, %c0_41] : memref<512x256xbf16, #tpu.memory_space<vmem>>, vector<128x256xbf16>
    %cst_42 = arith.constant dense<0.000000e+00> : vector<16x256xf32>
    %75 = tpu.matmul %73, %74, %cst_42 {dimension_numbers = #tpu.dot_dimension_numbers<[1], [0], [0], [1], [0, 0, 1, 1], [], []>} : vector<16x128xbf16>, vector<128x256xbf16>, vector<16x256xf32> -> vector<16x256xf32>
    %76 = arith.addf %42, %75 : vector<16x256xf32>
    %c0_43 = arith.constant 0 : index
    %c0_44 = arith.constant 0 : index
    %77 = vector.load %arg6[%c0_43, %c0_44] : memref<16x256xf32, #tpu.memory_space<vmem>>, vector<16x256xf32>
    tpu.vector_store %arg6[%c0_43, %c0_44], %76 {strides = array<i32>} : memref<16x256xf32, #tpu.memory_space<vmem>>, vector<16x256xf32>,
    return
  }
}

</mosaic_0001>

<bundles_post_ra>
// kernel: tpu_custom_call.1
= control target key start
LH: loop header
LB: loop body
LE: loop exit
PB: predicated region body
PF: predicated region fallthrough
CT: control target
= control target key end

     0   :  { %11 = vsyncpa [#allocation4], 0  ;;  %s2057_s0 = inlined_call_operand.hbm [shape: f32[16,128], index: 0, kind: input, shape index: {}]   ;;  %s2058_s1 = inlined_call_operand.hbm [shape: bf16[128,256], index: 1, kind: input, shape index: {}]   ;;  %s2059_s2 = inlined_call_operand.hbm [shape: bf16[384,128], index: 2, kind: input, shape index: {}]   ;;  %s2060_s3 = inlined_call_operand.hbm [shape: f32[2,384], index: 3, kind: input, shape index: {}]   ;;  %s2061_s4 = inlined_call_operand.hbm [shape: bf16[512,256], index: 4, kind: input, shape index: {}]   ;;  %s2062_s5 = inlined_call_operand.vmem [shape: f32[1,256], index: 5, kind: input, shape index: {}]   ;;  %s2063_s6 = inlined_call_operand.hbm [shape: f32[16,256], index: 6, kind: output, shape index: {}]  }
   0x1   :  { %12 = vsyncpa [#allocation7], 0 }
   0x2   :  { %13 = vsyncpa [#allocation10], 0 }
   0x3   :  { %14 = vsyncpa [#allocation5], 0  ;;  %s32_s23 = sshll.u32 %s2058_s1, 4  ;;  %s1907_s24 = smov [#allocation6]   ;;  %s33_s23 = int_to_ptr.hbm [resolvable:$true] %s32_s23 }
   0x4   :  { %s34_s25 = sshll.u32 %s1907_s24, 4  ;;  %s59_s28 = sshll.u32 %s2060_s3, 4  ;;  %s35_s25 = int_to_ptr.vmem [resolvable:$true] %s34_s25  ;;  %s60_s28 = int_to_ptr.hbm [resolvable:$true] %s59_s28 }
   0x5   :  { %s1908_s29 = smov 128   ;;  %s1909_s30 = smov 8  }
   0x6   :  { %40 = dma.hbm_to_vmem [thread:$0]  %s33_s23, 2048, %s35_s25, [#allocation7], %s1908_s29, %s1908_s29, %s1909_s30  }
   0x7   :  { %s1910_s7 = smov [#allocation9]   ;;  %s19_s1 = sshll.u32 %s2057_s0, 4  ;;  %s20_s1 = int_to_ptr.hbm [resolvable:$true] %s19_s1 }
   0x8   :  { %s61_s8 = sshll.u32 %s1910_s7, 4  ;;  %s45_s3 = sshll.u32 %s2059_s2, 4  ;;  %s62_s8 = int_to_ptr.vmem [resolvable:$true] %s61_s8  ;;  %s46_s3 = int_to_ptr.hbm [resolvable:$true] %s45_s3 }
   0x9   :  { %64 = dma.hbm_to_vmem [thread:$0]  %s60_s28, 96, %s62_s8, [#allocation10]  }
   0xa   :  { %s1911_s13 = smov [#allocation3]   ;;  %s1912_s15 = smov [#allocation8]  }
   0xb   :  { %s21_s14 = sshll.u32 %s1911_s13, 4  ;;  %s47_s16 = sshll.u32 %s1912_s15, 4  ;;  %s22_s14 = int_to_ptr.vmem [resolvable:$true] %s21_s14  ;;  %s48_s16 = int_to_ptr.vmem [resolvable:$true] %s47_s16 }
   0xc   :  { %27 = dma.hbm_to_vmem [thread:$0]  %s20_s1, 256, %s22_s14, [#allocation4], %s1908_s29, %s1908_s29, %s1909_s30  }
   0xd   :  { %s1913_s17 = smov 64   ;;  %s1914_s0 = smov 4  }
   0xe   :  { %53 = dma.hbm_to_vmem [thread:$0]  %s46_s3, 3072, %s48_s16, [#allocation7], %s1913_s17, %s1913_s17, %s1914_s0  }
   0xf   :  { %s69_s20 = sshll.u32 %s2061_s4, 4  ;;  %s1915_s2 = smov [#allocation11]   ;;  %s70_s20 = int_to_ptr.hbm [resolvable:$true] %s69_s20 }
  0x10   :  { %s71_s21 = sshll.u32 %s1915_s2, 4  ;;  %s72_s21 = int_to_ptr.vmem [resolvable:$true] %s71_s21 }
  0x11   :  { %77 = dma.hbm_to_vmem [thread:$0]  %s70_s20, 8192, %s72_s21, [#allocation10], %s1908_s29, %s1908_s29, %s1909_s30  }
  0x12   :  { %1899 = dma.done.wait [#allocation4], 256  }
  0x13   :  { %1900 = vsyncadd [#allocation4], 4294967040 }
  0x14   :  { %1901 = dma.done.wait [#allocation7], 5120  }
  0x15   :  { %1902 = vsyncadd [#allocation7], 4294962176 }
  0x16   :  { %1903 = dma.done.wait [#allocation10], 8288  }
  0x17   :  { %1904 = vsyncadd [#allocation10], 4294959008  ;;  %v1323_v0 = vld [vmem:[#allocation6 + $0x70] sm:$0xf]  ;;  %v1661_v1 = vld [vmem:[#allocation6 + $0x74] sm:$0xf0] }
  0x18   :  { %v1660_v2 = vld [vmem:[#allocation6 + $0x74] sm:$0xf]  ;;  %v1324_v3 = vor.u32 %v1661_v1, %v1323_v0  ;;  %v1325_v4 = vld [vmem:[#allocation6 + $0x78] sm:$0xf0]  ;;  %v1315_v5 = vld [vmem:[#allocation6 + $0x60] sm:$0xf] }
  0x19   :  { %v1659_v6 = vld [vmem:[#allocation6 + $0x64] sm:$0xf0]  ;;  %v1328_v7 = vor.u32 %v1660_v2, %v1325_v4  ;;  %v1658_v8 = vld [vmem:[#allocation6 + $0x64] sm:$0xf]  ;;  %v1317_v9 = vld [vmem:[#allocation6 + $0x68] sm:$0xf0] }
  0x1a   :  { %346 = vmatpush.bf16.msra.mxu2 %v1324_v3  ;;  %v1316_v10 = vor.u32 %v1659_v6, %v1315_v5  ;;  %v1320_v11 = vor.u32 %v1658_v8, %v1317_v9  ;;  %v1307_v12 = vld [vmem:[#allocation6 + $0x50] sm:$0xf]  ;;  %v1657_v13 = vld [vmem:[#allocation6 + $0x54] sm:$0xf0]  ;;  %v1656_v14 = vld [vmem:[#allocation6 + $0x54] sm:$0xf] }
  0x1b   :  { %360 = vmatpush.bf16.msra.mxu3 %v1328_v7  ;;  %v1309_v15 = vld [vmem:[#allocation6 + $0x58] sm:$0xf0]  ;;  %v1308_v16 = vor.u32 %v1657_v13, %v1307_v12  ;;  %v1299_v18 = vld [vmem:[#allocation6 + $0x40] sm:$0xf]  ;;  %v1655_v19 = vld [vmem:[#allocation6 + $0x44] sm:$0xf0] }
  0x1c   :  { %v1312_v17 = vor.u32 %v1656_v14, %v1309_v15  ;;  %v1654_v20 = vld [vmem:[#allocation6 + $0x44] sm:$0xf]  ;;  %v1301_v21 = vld [vmem:[#allocation6 + $0x48] sm:$0xf0]  ;;  %v100_v22 = vld [vmem:[#allocation3] sm:$0xff]  ;;  %v1300_v23 = vor.u32 %v1655_v19, %v1299_v18  ;;  %vm444_vm5 = vcmask 1040384  }
  0x1d   :  { %v101_v24 = vld [vmem:[#allocation3 + $0x8] sm:$0xff]  ;;  %v1978_v25 = vpack.c.bf16 %v100_v22, %v100_v22  ;;  %v1304_v26 = vor.u32 %v1654_v20, %v1301_v21  ;;  %v1291_v27 = vld [vmem:[#allocation6 + $0x30] sm:$0xf]  ;;  %v1652_v30 = vld [vmem:[#allocation6 + $0x34] sm:$0xf]  ;;  %s1182_s26 = sshll.u32 %s2063_s6, 4  ;;  %s1183_s26 = int_to_ptr.hbm [resolvable:$true] %s1182_s26 }
  0x1e   :  { %347 = vmatpush.bf16.msra.mxu2 %v1316_v10  ;;  %v1653_v28 = vld [vmem:[#allocation6 + $0x34] sm:$0xf0]  ;;  %v1980_v29 = vpack.c.bf16 %v101_v24, %v101_v24  ;;  %v1293_v31 = vld [vmem:[#allocation6 + $0x38] sm:$0xf0]  ;;  %v1283_v34 = vld [vmem:[#allocation6 + $0x20] sm:$0xf] }
  0x1f   :  { %361 = vmatpush.bf16.msra.mxu3 %v1320_v11  ;;  %104 = vst [vmem:[#allocation2 + $0xc] sm:$0xf] %v1978_v25  ;;  %v1292_v32 = vor.u32 %v1653_v28, %v1291_v27  ;;  %v1296_v33 = vor.u32 %v1652_v30, %v1293_v31  ;;  %v1651_v35 = vld [vmem:[#allocation6 + $0x24] sm:$0xf0]  ;;  %v1650_v36 = vld [vmem:[#allocation6 + $0x24] sm:$0xf] }
  0x20   :  { %105 = vst [vmem:[#allocation2 + $0x1c] sm:$0xf] %v1980_v29  ;;  %v1285_v37 = vld [vmem:[#allocation6 + $0x28] sm:$0xf0]  ;;  %v1284_v38 = vor.u32 %v1651_v35, %v1283_v34  ;;  %v1275_v40 = vld [vmem:[#allocation6 + $0x10] sm:$0xf] }
  0x21   :  { %v1288_v39 = vor.u32 %v1650_v36, %v1285_v37  ;;  %v1649_v41 = vld [vmem:[#allocation6 + $0x14] sm:$0xf0]  ;;  %v1648_v42 = vld [vmem:[#allocation6 + $0x14] sm:$0xf]  ;;  %v1277_v43 = vld [vmem:[#allocation6 + $0x18] sm:$0xf0] }
  0x22   :  { %348 = vmatpush.bf16.msra.mxu2 %v1308_v16  ;;  %v1276_v44 = vor.u32 %v1649_v41, %v1275_v40  ;;  %v1280_v45 = vor.u32 %v1648_v42, %v1277_v43  ;;  %v1267_v46 = vld [vmem:[#allocation6] sm:$0xf]  ;;  %v1647_v47 = vld [vmem:[#allocation6 + $0x4] sm:$0xf0]  ;;  %v1646_v48 = vld [vmem:[#allocation6 + $0x4] sm:$0xf] }
  0x23   :  { %362 = vmatpush.bf16.msra.mxu3 %v1312_v17  ;;  %v1269_v49 = vld [vmem:[#allocation6 + $0x8] sm:$0xf0]  ;;  %v1268_v50 = vor.u32 %v1647_v47, %v1267_v46  ;;  %v1255_v55 = vld [vmem:[#allocation11 + $0x1f0] sm:$0xf]  ;;  %v1644_v56 = vld [vmem:[#allocation11 + $0x1f4] sm:$0xf0] }
  0x24   :  { %v1272_v53 = vor.u32 %v1646_v48, %v1269_v49  ;;  %v1643_v57 = vld [vmem:[#allocation11 + $0x1f4] sm:$0xf]  ;;  %v1256_v58 = vor.u32 %v1644_v56, %v1255_v55  ;;  %v1257_v59 = vld [vmem:[#allocation11 + $0x1f8] sm:$0xf0]  ;;  %v1247_v60 = vld [vmem:[#allocation11 + $0x1e0] sm:$0xf] }
  0x25   :  { %v1642_v61 = vld [vmem:[#allocation11 + $0x1e4] sm:$0xf0]  ;;  %v1260_v62 = vor.u32 %v1643_v57, %v1257_v59  ;;  %v1641_v63 = vld [vmem:[#allocation11 + $0x1e4] sm:$0xf]  ;;  %v1249_v0 = vld [vmem:[#allocation11 + $0x1e8] sm:$0xf0] }
  0x26   :  { %349 = vmatpush.bf16.msra.mxu2 %v1300_v23  ;;  %v1263_v51 = vld [vmem:[#allocation2 + $0xc] sm:$0xf]  ;;  %214 = vmatpush.bf16.msra.mxu0 %v1256_v58  ;;  %v1248_v1 = vor.u32 %v1642_v61, %v1247_v60  ;;  %v1252_v2 = vor.u32 %v1641_v63, %v1249_v0  ;;  %v1239_v3 = vld [vmem:[#allocation11 + $0x1d0] sm:$0xf]  ;;  %v1241_v7 = vld [vmem:[#allocation11 + $0x1d8] sm:$0xf0] }
  0x27   :  { %363 = vmatpush.bf16.msra.mxu3 %v1304_v26  ;;  %v1645_v52 = vld [vmem:[#allocation2 + $0x18] sm:$0xf0]  ;;  %228 = vmatpush.bf16.msra.mxu1 %v1260_v62  ;;  %v1640_v4 = vld [vmem:[#allocation11 + $0x1d4] sm:$0xf0]  ;;  %v1639_v5 = vld [vmem:[#allocation11 + $0x1d4] sm:$0xf] }
  0x28   :  { %v1264_v54 = vor.u32 %v1645_v52, %v1263_v51  ;;  %v1240_v6 = vor.u32 %v1640_v4, %v1239_v3  ;;  %v1244_v8 = vor.u32 %v1639_v5, %v1241_v7  ;;  %v1231_v9 = vld [vmem:[#allocation11 + $0x1c0] sm:$0xf]  ;;  %v1638_v10 = vld [vmem:[#allocation11 + $0x1c4] sm:$0xf0]  ;;  %v1637_v11 = vld [vmem:[#allocation11 + $0x1c4] sm:$0xf] }
  0x29   :  { %v1232_v12 = vor.u32 %v1638_v10, %v1231_v9  ;;  %v1233_v13 = vld [vmem:[#allocation11 + $0x1c8] sm:$0xf0]  ;;  %v1223_v15 = vld [vmem:[#allocation11 + $0x1b0] sm:$0xf]  ;;  %v1636_v16 = vld [vmem:[#allocation11 + $0x1b4] sm:$0xf0] }
  0x2a   :  { %350 = vmatpush.bf16.msra.mxu2 %v1292_v32  ;;  %215 = vmatpush.bf16.msra.mxu0 %v1248_v1  ;;  %v1236_v14 = vor.u32 %v1637_v11, %v1233_v13  ;;  %v1635_v17 = vld [vmem:[#allocation11 + $0x1b4] sm:$0xf]  ;;  %v1224_v18 = vor.u32 %v1636_v16, %v1223_v15  ;;  %v1225_v19 = vld [vmem:[#allocation11 + $0x1b8] sm:$0xf0]  ;;  %v1215_v21 = vld [vmem:[#allocation11 + $0x1a0] sm:$0xf] }
  0x2b   :  { %364 = vmatpush.bf16.msra.mxu3 %v1296_v33  ;;  %229 = vmatpush.bf16.msra.mxu1 %v1252_v2  ;;  %v1228_v20 = vor.u32 %v1635_v17, %v1225_v19  ;;  %v1634_v22 = vld [vmem:[#allocation11 + $0x1a4] sm:$0xf0]  ;;  %v1633_v23 = vld [vmem:[#allocation11 + $0x1a4] sm:$0xf]  ;;  %v1217_v26 = vld [vmem:[#allocation11 + $0x1a8] sm:$0xf0] }
  0x2c   :  { %v1216_v24 = vor.u32 %v1634_v22, %v1215_v21  ;;  %v1220_v27 = vor.u32 %v1633_v23, %v1217_v26  ;;  %v1207_v28 = vld [vmem:[#allocation11 + $0x190] sm:$0xf]  ;;  %v1632_v30 = vld [vmem:[#allocation11 + $0x194] sm:$0xf0]  ;;  %v1631_v31 = vld [vmem:[#allocation11 + $0x194] sm:$0xf] }
  0x2d   :  { %v1208_v32 = vor.u32 %v1632_v30, %v1207_v28  ;;  %v1209_v33 = vld [vmem:[#allocation11 + $0x198] sm:$0xf0]  ;;  %v1199_v35 = vld [vmem:[#allocation11 + $0x180] sm:$0xf]  ;;  %v1630_v36 = vld [vmem:[#allocation11 + $0x184] sm:$0xf0] }
  0x2e   :  { %351 = vmatpush.bf16.msra.mxu2 %v1284_v38  ;;  %216 = vmatpush.bf16.msra.mxu0 %v1240_v6  ;;  %v1212_v34 = vor.u32 %v1631_v31, %v1209_v33  ;;  %v1629_v37 = vld [vmem:[#allocation11 + $0x184] sm:$0xf]  ;;  %v1201_v40 = vld [vmem:[#allocation11 + $0x188] sm:$0xf0]  ;;  %v1387_v41 = vld [vmem:[#allocation11 + $0xf0] sm:$0xf] }
  0x2f   :  { %365 = vmatpush.bf16.msra.mxu3 %v1288_v39  ;;  %230 = vmatpush.bf16.msra.mxu1 %v1244_v8  ;;  %v1200_v39 = vor.u32 %v1630_v36, %v1199_v35  ;;  %v1677_v42 = vld [vmem:[#allocation11 + $0xf4] sm:$0xf0]  ;;  %v1451_v46 = vld [vmem:[#allocation11 + $0x170] sm:$0xf]  ;;  %v1676_v48 = vld [vmem:[#allocation11 + $0xf4] sm:$0xf] }
  0x30   :  { %v1693_v47 = vld [vmem:[#allocation11 + $0x174] sm:$0xf0]  ;;  %v1379_v52 = vld [vmem:[#allocation11 + $0xe0] sm:$0xf]  ;;  %v1691_v56 = vld [vmem:[#allocation11 + $0x164] sm:$0xf0] }
  0x31   :  { %v1452_v49 = vor.u32 %v1693_v47, %v1451_v46  ;;  %v1674_v57 = vld [vmem:[#allocation11 + $0xe4] sm:$0xf]  ;;  %v1381_v58 = vld [vmem:[#allocation11 + $0xe8] sm:$0xf0]  ;;  %v1371_v2 = vld [vmem:[#allocation11 + $0xd0] sm:$0xf] }
  0x32   :  { %352 = vmatpush.bf16.msra.mxu2 %v1276_v44  ;;  %217 = vmatpush.bf16.msra.mxu0 %v1232_v12  ;;  %v1204_v44 = vor.u32 %v1629_v37, %v1201_v40  ;;  %v1384_v60 = vor.u32 %v1674_v57, %v1381_v58  ;;  %v1673_v3 = vld [vmem:[#allocation11 + $0xd4] sm:$0xf0]  ;;  %v1435_v4 = vld [vmem:[#allocation11 + $0x150] sm:$0xf]  ;;  %v1672_v10 = vld [vmem:[#allocation11 + $0xd4] sm:$0xf] }
  0x33   :  { %366 = vmatpush.bf16.msra.mxu3 %v1280_v45  ;;  %231 = vmatpush.bf16.msra.mxu1 %v1236_v14  ;;  %v1388_v45 = vor.u32 %v1677_v42, %v1387_v41  ;;  %v1372_v8 = vor.u32 %v1673_v3, %v1371_v2  ;;  %v1689_v9 = vld [vmem:[#allocation11 + $0x154] sm:$0xf0]  ;;  %v1373_v11 = vld [vmem:[#allocation11 + $0xd8] sm:$0xf0]  ;;  %v1671_v19 = vld [vmem:[#allocation11 + $0xc4] sm:$0xf0] }
  0x34   :  { %v1436_v14 = vor.u32 %v1689_v9, %v1435_v4  ;;  %v1376_v15 = vor.u32 %v1672_v10, %v1373_v11  ;;  %v1427_v23 = vld [vmem:[#allocation11 + $0x140] sm:$0xf]  ;;  %v1670_v30 = vld [vmem:[#allocation11 + $0xc4] sm:$0xf]  ;;  %v1365_v31 = vld [vmem:[#allocation11 + $0xc8] sm:$0xf0] }
  0x35   :  { %v1692_v35 = vld [vmem:[#allocation11 + $0x174] sm:$0xf]  ;;  %v1453_v36 = vld [vmem:[#allocation11 + $0x178] sm:$0xf0]  ;;  %v1355_v41 = vld [vmem:[#allocation11 + $0xb0] sm:$0xf] }
  0x36   :  { %353 = vmatpush.bf16.msra.mxu2 %v1268_v50  ;;  %218 = vmatpush.bf16.msra.mxu0 %v1224_v18  ;;  %v1389_v50 = vld [vmem:[#allocation11 + $0xf8] sm:$0xf0]  ;;  %v1363_v18 = vld [vmem:[#allocation11 + $0xc0] sm:$0xf]  ;;  %v1456_v40 = vor.u32 %v1692_v35, %v1453_v36  ;;  %v1669_v42 = vld [vmem:[#allocation11 + $0xb4] sm:$0xf0] }
  0x37   :  { %367 = vmatpush.bf16.msra.mxu3 %v1272_v53  ;;  %232 = vmatpush.bf16.msra.mxu1 %v1228_v20  ;;  %v1392_v51 = vor.u32 %v1676_v48, %v1389_v50  ;;  %v1675_v53 = vld [vmem:[#allocation11 + $0xe4] sm:$0xf0]  ;;  %v1364_v22 = vor.u32 %v1671_v19, %v1363_v18  ;;  %v1356_v46 = vor.u32 %v1669_v42, %v1355_v41  ;;  %v1419_v47 = vld [vmem:[#allocation11 + $0x130] sm:$0xf]  ;;  %v1685_v48 = vld [vmem:[#allocation11 + $0x134] sm:$0xf0] }
  0x38   :  { %v1380_v55 = vor.u32 %v1675_v53, %v1379_v52  ;;  %v1668_v52 = vld [vmem:[#allocation11 + $0xb4] sm:$0xf]  ;;  %v1357_v53 = vld [vmem:[#allocation11 + $0xb8] sm:$0xf0]  ;;  %v1690_v57 = vld [vmem:[#allocation11 + $0x164] sm:$0xf] }
  0x39   :  { %354 = vmatmul.bf16.vlgmr.msra.gmra.mxu2 %v1264_v54  ;;  %v1445_v58 = vld [vmem:[#allocation11 + $0x168] sm:$0xf0]  ;;  %v1666_v10 = vld [vmem:[#allocation11 + $0xa4] sm:$0xf]  ;;  %v1331_v42 = vld [vmem:[#allocation11 + $0x80] sm:$0xf] }
  0x3a   :  { %368 = vmatmul.bf16.vlgmr.msra.gmra.mxu3 %v1264_v54  ;;  %219 = vmatpush.bf16.msra.mxu0 %v1216_v24  ;;  %v1443_v54 = vld [vmem:[#allocation11 + $0x160] sm:$0xf]  ;;  %v1687_v24 = vld [vmem:[#allocation11 + $0x144] sm:$0xf0]  ;;  %v1349_v11 = vld [vmem:[#allocation11 + $0xa8] sm:$0xf0] }
  0x3b   :  { %233 = vmatpush.bf16.msra.mxu1 %v1220_v27  ;;  %712 = vmatpush.bf16.msrb.mxu2 %v1392_v51  ;;  %v1444_v59 = vor.u32 %v1691_v56, %v1443_v54  ;;  %v1428_v28 = vor.u32 %v1687_v24, %v1427_v23  ;;  %v1420_v51 = vor.u32 %v1685_v48, %v1419_v47  ;;  %v1665_v23 = vld [vmem:[#allocation11 + $0x94] sm:$0xf0]  ;;  %v1679_v48 = vld [vmem:[#allocation11 + $0x104] sm:$0xf0]  ;;  %s1917_s27 = smov 256   ;;  %s1918_s28 = smov 16  }
  0x3c   :  { %726 = vmatpush.bf16.msrb.mxu3 %v1456_v40  ;;  %v1360_v56 = vor.u32 %v1668_v52, %v1357_v53  ;;  %v1333_v52 = vld [vmem:[#allocation11 + $0x88] sm:$0xf0]  ;;  %v1684_v53 = vld [vmem:[#allocation11 + $0x134] sm:$0xf] }
  0x3e   :  { %220 = vmatpush.bf16.msra.mxu0 %v1208_v32 }
  0x3f   :  { %234 = vmatpush.bf16.msra.mxu1 %v1212_v34  ;;  %713 = vmatpush.bf16.msrb.mxu2 %v1384_v60  ;;  %v1368_v34 = vor.u32 %v1670_v30, %v1365_v31  ;;  %v1681_v30 = vld [vmem:[#allocation11 + $0x114] sm:$0xf0] }
  0x42   :  { %221 = vmatpush.bf16.msra.mxu0 %v1200_v39 }
  0x43   :  { %235 = vmatpush.bf16.msra.mxu1 %v1204_v44  ;;  %714 = vmatpush.bf16.msrb.mxu2 %v1376_v15  ;;  %v1688_v15 = vld [vmem:[#allocation11 + $0x154] sm:$0xf] }
  0x46   :  { %684 = vmatpush.bf16.msrb.mxu0 %v1388_v45 }
  0x47   :  { %698 = vmatpush.bf16.msrb.mxu1 %v1452_v49  ;;  %715 = vmatpush.bf16.msrb.mxu2 %v1368_v34  ;;  %v1664_v34 = vld [vmem:[#allocation11 + $0x94] sm:$0xf] }
  0x4a   :  { %685 = vmatpush.bf16.msrb.mxu0 %v1380_v55 }
  0x4b   :  { %699 = vmatpush.bf16.msrb.mxu1 %v1444_v59  ;;  %716 = vmatpush.bf16.msrb.mxu2 %v1360_v56  ;;  %v1421_v56 = vld [vmem:[#allocation11 + $0x138] sm:$0xf0] }
  0x4e   :  { %686 = vmatpush.bf16.msrb.mxu0 %v1372_v8 }
  0x4f   :  { %700 = vmatpush.bf16.msrb.mxu1 %v1436_v14  ;;  %v1352_v14 = vor.u32 %v1666_v10, %v1349_v11  ;;  %v1702_v10 = vld [vmem:[#allocation8 + $0x28] sm:$0xff] }
  0x50   :  { %v1710_v11 = vld [vmem:[#allocation8 + $0x68] sm:$0xff] }
  0x51   :  { %717 = vmatpush.bf16.msrb.mxu2 %v1352_v14 }
  0x52   :  { %687 = vmatpush.bf16.msrb.mxu0 %v1364_v22  ;;  %v1339_v22 = vld [vmem:[#allocation11 + $0x90] sm:$0xf] }
  0x53   :  { %701 = vmatpush.bf16.msrb.mxu1 %v1428_v28  ;;  %v1403_v28 = vld [vmem:[#allocation11 + $0x110] sm:$0xf] }
  0x56   :  { %688 = vmatpush.bf16.msrb.mxu0 %v1356_v46 }
  0x57   :  { %702 = vmatpush.bf16.msrb.mxu1 %v1420_v51 }
  0xbc   :  { %v1984_v38 = vpop.f32.mrf.mxu2 }
  0xbd   :  { %v1986_v43 = vpop.f32.mrf.mxu3  ;;  %v390_v62 = vmul.f32 %v1984_v38, %v1984_v38 }
  0xbe   :  { %v391_v5 = vmul.f32 %v1986_v43, %v1986_v43 }
  0xc4   :  { %v1988_v61 = vpop.f32.mrf.mxu2 }
  0xc5   :  { %v374_v63 = vadd.f32 %v1988_v61, %v1984_v38  ;;  %v392_v0 = vmul.f32 %v1988_v61, %v1988_v61  ;;  %v1996_v1 = vpop.f32.mrf.mxu3 }
  0xc6   :  { %v381_v6 = vadd.f32 %v1996_v1, %v1986_v43  ;;  %v393_v7 = vmul.f32 %v1996_v1, %v1996_v1 }
  0xc7   :  { %v375_v12 = vrot.slane %v374_v63, 4  ;;  %v394_v13 = vadd.f32 %v392_v0, %v390_v62  ;;  %v1448_v62 = vor.u32 %v1690_v57, %v1445_v58  ;;  %v1667_v0 = vld [vmem:[#allocation11 + $0xa4] sm:$0xf0]  ;;  %v1704_v57 = vld [vmem:[#allocation8 + $0x38] sm:$0xff] }
  0xc8   :  { %v382_v16 = vrot.slane %v381_v6, 4  ;;  %v401_v17 = vadd.f32 %v393_v7, %v391_v5  ;;  %v1411_v5 = vld [vmem:[#allocation11 + $0x120] sm:$0xf]  ;;  %v1712_v58 = vld [vmem:[#allocation8 + $0x78] sm:$0xff] }
  0xc9   :  { %v376_v20 = vadd.f32 %v375_v12, %v374_v63  ;;  %v395_v21 = vrot.slane %v394_v13, 4  ;;  %v1347_v63 = vld [vmem:[#allocation11 + $0xa0] sm:$0xf]  ;;  %727 = vmatpush.bf16.msrb.mxu3 %v1448_v62  ;;  %v1720_v62 = vld [vmem:[#allocation8 + $0xb8] sm:$0xff] }
  0xca   :  { %v383_v26 = vadd.f32 %v382_v16, %v381_v6  ;;  %v402_v27 = vrot.slane %v401_v17, 4  ;;  %v1348_v4 = vor.u32 %v1667_v0, %v1347_v63  ;;  %v1683_v6 = vld [vmem:[#allocation11 + $0x124] sm:$0xf0]  ;;  %v1437_v16 = vld [vmem:[#allocation11 + $0x158] sm:$0xf0] }
  0xcb   :  { %v377_v32 = vrot.slane %v376_v20, 2  ;;  %v396_v33 = vadd.f32 %v395_v21, %v394_v13  ;;  %v1412_v9 = vor.u32 %v1683_v6, %v1411_v5  ;;  %v131_v21 = vunpack.c.l.b16 %v1980_v29  ;;  %v1341_v29 = vld [vmem:[#allocation11 + $0x98] sm:$0xf0]  ;;  %v1682_v63 = vld [vmem:[#allocation11 + $0x124] sm:$0xf]  ;;  %v1719_v5 = vld [vmem:[#allocation8 + $0xb0] sm:$0xff] }
  0xcc   :  { %v384_v37 = vrot.slane %v383_v26, 2  ;;  %v403_v39 = vadd.f32 %v402_v27, %v401_v17  ;;  %v130_v17 = vunpack.c.l.b16 %v1978_v25  ;;  %689 = vmatpush.bf16.msrb.mxu0 %v1348_v4  ;;  %v1340_v27 = vor.u32 %v1665_v23, %v1339_v22  ;;  %v1413_v0 = vld [vmem:[#allocation11 + $0x128] sm:$0xf0]  ;;  %v1680_v6 = vld [vmem:[#allocation11 + $0x114] sm:$0xf]  ;;  %v1701_v23 = vld [vmem:[#allocation8 + $0x20] sm:$0xff] }
  0xcd   :  { %v378_v44 = vadd.f32 %v377_v32, %v376_v20  ;;  %v397_v45 = vrot.slane %v396_v33, 2  ;;  %v1440_v20 = vor.u32 %v1688_v15, %v1437_v16  ;;  %703 = vmatpush.bf16.msrb.mxu1 %v1412_v9  ;;  %v1344_v36 = vor.u32 %v1664_v34, %v1341_v29  ;;  %v1711_v4 = vld [vmem:[#allocation8 + $0x70] sm:$0xff]  ;;  %v1718_v15 = vld [vmem:[#allocation8 + $0xa8] sm:$0xff] }
  0xce   :  { %v385_v49 = vadd.f32 %v384_v37, %v383_v26  ;;  %v404_v50 = vrot.slane %v403_v39, 2  ;;  %v132_v32 = vpack.c.b16 %v131_v21, %v130_v17  ;;  %v1686_v37 = vld [vmem:[#allocation11 + $0x144] sm:$0xf] }
  0xcf   :  { %v379_v54 = vrot.slane %v378_v44, 1  ;;  %v398_v55 = vadd.f32 %v397_v45, %v396_v33  ;;  %728 = vmatpush.bf16.msrb.mxu3 %v1440_v20  ;;  %v1404_v33 = vor.u32 %v1681_v30, %v1403_v28  ;;  %v1395_v45 = vld [vmem:[#allocation11 + $0x100] sm:$0xf]  ;;  %718 = vmatpush.bf16.msrb.mxu2 %v1344_v36  ;;  %v1678_v17 = vld [vmem:[#allocation11 + $0x104] sm:$0xf]  ;;  %v1699_v36 = vld [vmem:[#allocation8 + $0x10] sm:$0xff] }
  0xd0   :  { %v386_v59 = vrot.slane %v385_v49, 1  ;;  %v405_v60 = vadd.f32 %v404_v50, %v403_v39  ;;  %v1429_v39 = vld [vmem:[#allocation11 + $0x148] sm:$0xf0]  ;;  %222 = vmatmul.bf16.vlgmr.msra.gmra.mxu0 %v132_v32  ;;  %236 = vmatmul.bf16.vlgmr.msra.gmra.mxu1 %v132_v32  ;;  %v1396_v51 = vor.u32 %v1679_v48, %v1395_v45  ;;  %v1708_v32 = vld [vmem:[#allocation8 + $0x58] sm:$0xff]  ;;  %v1714_v48 = vld [vmem:[#allocation8 + $0x88] sm:$0xff] }
  0xd1   :  { %v380_v2 = vadd.f32 %v379_v54, %v378_v44  ;;  %v399_v3 = vrot.slane %v398_v55, 1  ;;  %v1432_v41 = vor.u32 %v1686_v37, %v1429_v39  ;;  %v1663_v44 = vld [vmem:[#allocation11 + $0x84] sm:$0xf0]  ;;  %690 = vmatpush.bf16.msrb.mxu0 %v1340_v27  ;;  %704 = vmatpush.bf16.msrb.mxu1 %v1404_v33  ;;  %v1717_v27 = vld [vmem:[#allocation8 + $0xa0] sm:$0xff]  ;;  %v1716_v33 = vld [vmem:[#allocation8 + $0x98] sm:$0xff] }
  0xd2   :  { %v387_v7 = vadd.f32 %v386_v59, %v385_v49  ;;  %v406_v8 = vrot.slane %v405_v60, 1  ;;  %v1332_v47 = vor.u32 %v1663_v44, %v1331_v42  ;;  %v1662_v49 = vld [vmem:[#allocation11 + $0x84] sm:$0xf]  ;;  %v1707_v37 = vld [vmem:[#allocation8 + $0x50] sm:$0xff] }
  0xd3   :  { %v2004_v12 = vmul.f32 0.0625, %v380_v2  ;;  %v400_v13 = vadd.f32 %v399_v3, %v398_v55  ;;  %729 = vmatpush.bf16.msrb.mxu3 %v1432_v41  ;;  %v1336_v55 = vor.u32 %v1662_v49, %v1333_v52  ;;  %v1416_v2 = vor.u32 %v1682_v63, %v1413_v0  ;;  %v1703_v3 = vld [vmem:[#allocation8 + $0x30] sm:$0xff]  ;;  %v416_v39 = vld [vmem:[#allocation9] ss:$2 sm:$0x3] }
  0xd4   :  { %v2007_v18 = vmul.f32 0.0625, %v387_v7  ;;  %v407_v19 = vadd.f32 %v406_v8, %v405_v60  ;;  %v1424_v60 = vor.u32 %v1684_v53, %v1421_v56  ;;  %v1405_v7 = vld [vmem:[#allocation11 + $0x118] sm:$0xf0]  ;;  %v1715_v41 = vld [vmem:[#allocation8 + $0x90] sm:$0xff] }
  0xd5   :  { %v408_v24 = vmul.f32 0.0625, %v400_v13  ;;  %v410_v26 = vmul.f32 %v2004_v12, %v2004_v12  ;;  %691 = vmatpush.bf16.msrb.mxu0 %v1332_v47  ;;  %705 = vmatpush.bf16.msrb.mxu1 %v1396_v51  ;;  %v1408_v8 = vor.u32 %v1680_v6, %v1405_v7  ;;  %v1706_v47 = vld [vmem:[#allocation8 + $0x48] sm:$0xff]  ;;  %v1697_v52 = vld [vmem:[#allocation8] sm:$0xff] }
  0xd6   :  { %v409_v31 = vmul.f32 0.0625, %v407_v19  ;;  %v411_v25 = vmul.f32 %v2007_v18, %v2007_v18  ;;  %719 = vmatpush.bf16.msrb.mxu2 %v1336_v55  ;;  %v1397_v19 = vld [vmem:[#allocation11 + $0x108] sm:$0xf0]  ;;  %v1705_v53 = vld [vmem:[#allocation8 + $0x40] sm:$0xff] }
  0xd7   :  { %v412_v35 = vsub.f32 %v408_v24, %v410_v26  ;;  %730 = vmatpush.bf16.msrb.mxu3 %v1424_v60  ;;  %v1400_v21 = vor.u32 %v1678_v17, %v1397_v19  ;;  %v1709_v24 = vld [vmem:[#allocation8 + $0x60] sm:$0xff]  ;;  %v1696_v17 = vld [vmem:[#allocation2 + $0x18] sm:$0xf0] }
  0xd8   :  { %v413_v40 = vsub.f32 %v409_v31, %v411_v25  ;;  %v1700_v25 = vld [vmem:[#allocation8 + $0x18] sm:$0xff]  ;;  %v418_v55 = vld [vmem:[#allocation9 + $0x1] ss:$2 sm:$0x3] }
  0xd9   :  { %v414_v46 = vmax.f32 %v412_v35, 0.0  ;;  %956 = vmatpush.bf16.msra.mxu0 %v1704_v57  ;;  %970 = vmatpush.bf16.msra.mxu1 %v1712_v58 }
  0xda   :  { %v415_v50 = vmax.f32 %v413_v40, 0.0  ;;  %984 = vmatpush.bf16.msra.mxu2 %v1720_v62 }
  0xdb   :  { %v2014_v54 = vadd.f32 1e-05, %v414_v46  ;;  %731 = vmatpush.bf16.msrb.mxu3 %v1416_v2  ;;  %v1698_v46 = vld [vmem:[#allocation8 + $0x8] sm:$0xff] }
  0xdc   :  { %v420_v59 = vadd.f32 1e-05, %v415_v50 }
  0xdd   :  { %1749 = vrsqrt.f32 %v2014_v54  ;;  %957 = vmatpush.bf16.msra.mxu0 %v1703_v3  ;;  %971 = vmatpush.bf16.msra.mxu1 %v1711_v4  ;;  %vm427_vm4 = vweird.f32 %v2014_v54 }
  0xde   :  { %1751 = vrsqrt.f32 %v420_v59  ;;  %985 = vmatpush.bf16.msra.mxu2 %v1719_v5  ;;  %vm437_vm2 = vweird.f32 %v420_v59 }
  0xdf   :  { %732 = vmatpush.bf16.msrb.mxu3 %v1408_v8 }
  0xe1   :  { %958 = vmatpush.bf16.msra.mxu0 %v1702_v10  ;;  %972 = vmatpush.bf16.msra.mxu1 %v1710_v11 }
  0xe2   :  { %986 = vmatpush.bf16.msra.mxu2 %v1718_v15 }
  0xe3   :  { %v1750_v9 = vpop.eup %1749  ;;  %733 = vmatpush.bf16.msrb.mxu3 %v1400_v21 }
  0xe4   :  { %v1752_v13 = vpop.eup %1751  ;;  %v422_v14 = vmul.f32 %v1750_v9, %v2014_v54  ;;  %vm428_vm1 = vweird.f32 %v1750_v9  ;;  %v1713_v54 = vld [vmem:[#allocation8 + $0x80] sm:$0xff] }
  0xe5   :  { %v432_v16 = vmul.f32 %v1752_v13, %v420_v59  ;;  %vm438_vm0 = vweird.f32 %v1752_v13  ;;  %959 = vmatpush.bf16.msra.mxu0 %v1701_v23  ;;  %973 = vmatpush.bf16.msra.mxu1 %v1709_v24  ;;  %vm429_vm6 = vmor %vm427_vm4, %vm428_vm1 }
  0xe6   :  { %v423_v20 = vmul.f32 %v1750_v9, %v422_v14  ;;  %987 = vmatpush.bf16.msra.mxu2 %v1717_v27  ;;  %vm439_vm3 = vmor %vm437_vm2, %vm438_vm0 }
  0xe7   :  { %v433_v22 = vmul.f32 %v1752_v13, %v432_v16  ;;  %v1467_v16 = vld [vmem:[#allocation2 + $0xc] sm:$0xf] }
  0xe8   :  { %v424_v26 = vmul.f32 0.5, %v423_v20 }
  0xe9   :  { %v434_v28 = vmul.f32 0.5, %v433_v22  ;;  %960 = vmatpush.bf16.msra.mxu0 %v1700_v25  ;;  %974 = vmatpush.bf16.msra.mxu1 %v1708_v32  ;;  %v1468_v22 = vor.u32 %v1696_v17, %v1467_v16 }
  0xea   :  { %v425_v30 = vsub.f32 1.5, %v424_v26  ;;  %988 = vmatpush.bf16.msra.mxu2 %v1716_v33 }
  0xeb   :  { %v435_v31 = vsub.f32 1.5, %v434_v28 }
  0xec   :  { %v426_v34 = vmul.f32 %v1750_v9, %v425_v30 }
  0xed   :  { %v436_v29 = vmul.f32 %v1752_v13, %v435_v31  ;;  %961 = vmatpush.bf16.msra.mxu0 %v1699_v36  ;;  %975 = vmatpush.bf16.msra.mxu1 %v1707_v37  ;;  %v122_v31 = vld [vmem:[%s2062_s5] sm:$0x3]  ;;  %s1916_s5 = smov [#allocation12]  }
  0xee   :  { %v430_v42 = vsel %vm429_vm6, %v1750_v9, %v426_v34  ;;  %989 = vmatpush.bf16.msra.mxu2 %v1715_v41  ;;  %v124_v25 = vperm.slane %v122_v31, 0  ;;  %v125_v36 = vperm.slane %v122_v31, 1  ;;  %s1180_s23 = sshll.u32 %s1916_s5, 4  ;;  %s1181_s23 = int_to_ptr.vmem [resolvable:$true] %s1180_s23 }
  0xef   :  { %v440_v35 = vsel %vm439_vm3, %v1752_v13, %v436_v29 }
  0xf0   :  { %v443_v40 = vrot.slane %v440_v35, 7 }
  0xf1   :  { %962 = vmatpush.bf16.msra.mxu0 %v1698_v46  ;;  %976 = vmatpush.bf16.msra.mxu1 %v1706_v47 }
  0xf2   :  { %v445_v44 = vsel %vm444_vm5, %v430_v42, %v443_v40  ;;  %990 = vmatpush.bf16.msra.mxu2 %v1714_v48 }
  0xf3   :  { %v447_v45 = vmul.f32 %v445_v44, %v416_v39 }
  0xf5   :  { %v449_v49 = vperm.slane %v447_v45, 0  ;;  %v450_v50 = vperm.slane %v447_v45, 1  ;;  %963 = vmatpush.bf16.msra.mxu0 %v1697_v52  ;;  %977 = vmatpush.bf16.msra.mxu1 %v1705_v53 }
  0xf6   :  { %991 = vmatpush.bf16.msra.mxu2 %v1713_v54 }
  0xf7   :  { %v454_v51 = vmul.f32 %v450_v50, %v2007_v18  ;;  %v453_v56 = vmul.f32 %v449_v49, %v2004_v12  ;;  %v462_v60 = vmul.f32 %v450_v50, %v1986_v43  ;;  %v463_v18 = vmul.f32 %v449_v49, %v1988_v61 }
  0xf8   :  { %v464_v62 = vmul.f32 %v450_v50, %v1996_v1  ;;  %v461_v2 = vmul.f32 %v449_v49, %v1984_v38 }
  0xf9   :  { %v457_v57 = vrot.slane %v454_v51, 7 }
  0xfb   :  { %v458_v58 = vsel %vm444_vm5, %v453_v56, %v457_v57  ;;  %v1623_v57 = vld [vmem:[#allocation11 + $0x70] sm:$0xf] }
  0xfc   :  { %v460_v59 = vsub.f32 %v418_v55, %v458_v58  ;;  %v1736_v58 = vld [vmem:[#allocation11 + $0x74] sm:$0xf0] }
  0xfe   :  { %v466_v63 = vperm.slane %v460_v59, 0  ;;  %v467_v0 = vperm.slane %v460_v59, 1  ;;  %v1735_v59 = vld [vmem:[#allocation11 + $0x74] sm:$0xf] }
 0x100   :  { %v471_v3 = vadd.f32 %v467_v0, %v462_v60  ;;  %v472_v4 = vadd.f32 %v466_v63, %v463_v18  ;;  %v473_v12 = vadd.f32 %v467_v0, %v464_v62  ;;  %v470_v5 = vadd.f32 %v466_v63, %v461_v2  ;;  %v1625_v18 = vld [vmem:[#allocation11 + $0x78] sm:$0xf0] }
 0x101   :  { %v1624_v60 = vor.u32 %v1736_v58, %v1623_v57  ;;  %v1628_v62 = vor.u32 %v1735_v59, %v1625_v18  ;;  %v1575_v57 = vld [vmem:[#allocation11 + $0x10] sm:$0xf]  ;;  %v1724_v58 = vld [vmem:[#allocation11 + $0x14] sm:$0xf0]  ;;  %v1577_v18 = vld [vmem:[#allocation11 + $0x18] sm:$0xf0] }
 0x102   :  { %v475_v6 = vmax.f32 %v471_v3, 0.0  ;;  %v476_v7 = vmax.f32 %v472_v4, 0.0  ;;  %v477_v8 = vmax.f32 %v473_v12, 0.0  ;;  %v474_v9 = vmax.f32 %v470_v5, 0.0  ;;  %v1615_v3 = vld [vmem:[#allocation11 + $0x60] sm:$0xf] }
 0x103   :  { %1140 = vmatpush.bf16.msra.mxu3 %v1624_v60  ;;  %v1734_v4 = vld [vmem:[#allocation11 + $0x64] sm:$0xf0]  ;;  %v1733_v12 = vld [vmem:[#allocation11 + $0x64] sm:$0xf]  ;;  %v1576_v59 = vor.u32 %v1724_v58, %v1575_v57  ;;  %v1723_v60 = vld [vmem:[#allocation11 + $0x14] sm:$0xf] }
 0x104   :  { %v479_v10 = vpack.c.bf16 %v477_v8, %v476_v7  ;;  %v478_v11 = vpack.c.bf16 %v475_v6, %v474_v9  ;;  %v1616_v5 = vor.u32 %v1734_v4, %v1615_v3  ;;  %v1617_v6 = vld [vmem:[#allocation11 + $0x68] sm:$0xf0]  ;;  %v1567_v3 = vld [vmem:[#allocation11] sm:$0xf]  ;;  %v1722_v4 = vld [vmem:[#allocation11 + $0x4] sm:$0xf0] }
 0x105   :  { %v1620_v9 = vor.u32 %v1733_v12, %v1617_v6  ;;  %v1721_v12 = vld [vmem:[#allocation11 + $0x4] sm:$0xf]  ;;  %v1569_v6 = vld [vmem:[#allocation11 + $0x8] sm:$0xf0] }
 0x106   :  { %481 = vst [vmem:[#allocation2 + $0x14] sm:$0xff] %v479_v10  ;;  %v516_v43 = vunpack.c.l.b16 %v478_v11  ;;  %v518_v13 = vunpack.c.l.b16 %v479_v10  ;;  %v517_v61 = vunpack.c.h.b16 %v478_v11  ;;  %v519_v14 = vunpack.c.h.b16 %v479_v10 }
 0x107   :  { %480 = vst [vmem:[#allocation2 + $0x4] sm:$0xff] %v478_v11  ;;  %1141 = vmatpush.bf16.msra.mxu3 %v1616_v5  ;;  %v1568_v5 = vor.u32 %v1722_v4, %v1567_v3 }
 0x108   :  { %v520_v1 = vpack.c.b16 %v518_v13, %v516_v43  ;;  %v521_v15 = vpack.c.b16 %v519_v14, %v517_v61  ;;  %v1607_v43 = vld [vmem:[#allocation11 + $0x50] sm:$0xf]  ;;  %v1732_v13 = vld [vmem:[#allocation11 + $0x54] sm:$0xf0]  ;;  %v1731_v61 = vld [vmem:[#allocation11 + $0x54] sm:$0xf] }
 0x109   :  { %v1608_v14 = vor.u32 %v1732_v13, %v1607_v43 }
 0x10a   :  { %692 = vmatmul.bf16.vlgmr.msrb.gmra.mxu0 %v520_v1  ;;  %706 = vmatmul.bf16.vlgmr.msrb.gmra.mxu1 %v521_v15 }
 0x10b   :  { %720 = vmatmul.bf16.vlgmr.msrb.gmra.mxu2 %v520_v1  ;;  %734 = vmatmul.bf16.vlgmr.msrb.gmra.mxu3 %v521_v15  ;;  %v1609_v1 = vld [vmem:[#allocation11 + $0x58] sm:$0xf0] }
 0x10c   :  { %1154 = vmatpush.bf16.msrb.mxu0 %v1628_v62  ;;  %v1612_v17 = vor.u32 %v1731_v61, %v1609_v1  ;;  %1142 = vmatpush.bf16.msra.mxu3 %v1608_v14 }
 0x10d   :  { %v1695_v38 = vld [vmem:[#allocation2 + $0x10] sm:$0xf0]  ;;  %v1461_v21 = vld [vmem:[#allocation2 + $0x14] sm:$0xf0] }
 0x10e   :  { %v1459_v19 = vld [vmem:[#allocation2 + $0x4] sm:$0xf]  ;;  %v1694_v20 = vld [vmem:[#allocation2 + $0x8] sm:$0xf] }
 0x10f   :  { %v1460_v23 = vor.u32 %v1695_v38, %v1459_v19  ;;  %v1464_v24 = vor.u32 %v1694_v20, %v1461_v21  ;;  %v1599_v21 = vld [vmem:[#allocation11 + $0x40] sm:$0xf] }
 0x110   :  { %1155 = vmatpush.bf16.msrb.mxu0 %v1620_v9  ;;  %v1572_v9 = vor.u32 %v1721_v12, %v1569_v6 }
 0x114   :  { %1156 = vmatpush.bf16.msrb.mxu0 %v1612_v17 }
 0x11a   :  { %964 = vmatmul.bf16.vlgmr.msra.gmra.mxu0 %v1460_v23  ;;  %978 = vmatmul.bf16.vlgmr.msra.gmra.mxu1 %v1464_v24  ;;  %v1729_v24 = vld [vmem:[#allocation11 + $0x44] sm:$0xf] }
 0x11b   :  { %992 = vmatmul.bf16.vlgmr.msra.gmra.mxu2 %v1468_v22  ;;  %v1730_v22 = vld [vmem:[#allocation11 + $0x44] sm:$0xf0] }
 0x11c   :  { %v1600_v23 = vor.u32 %v1730_v22, %v1599_v21 }
 0x11e   :  { %1143 = vmatpush.bf16.msra.mxu3 %v1600_v23 }
 0x14d   :  { %v223_v26 = vpop.f32.mrf.mxu0  ;;  %v237_v27 = vpop.f32.mrf.mxu1 }
 0x14e   :  { %v224_v34 = vadd.f32 %v223_v26, %v124_v25  ;;  %v238_v40 = vadd.f32 %v237_v27, %v125_v36  ;;  %v1601_v26 = vld [vmem:[#allocation11 + $0x48] sm:$0xf0] }
 0x155   :  { %v225_v28 = vpop.f32.mrf.mxu0  ;;  %v239_v30 = vpop.f32.mrf.mxu1 }
 0x156   :  { %v226_v45 = vadd.f32 %v225_v28, %v124_v25  ;;  %v240_v51 = vadd.f32 %v239_v30, %v125_v36  ;;  %v1604_v30 = vor.u32 %v1729_v24, %v1601_v26  ;;  %v1593_v36 = vld [vmem:[#allocation11 + $0x38] sm:$0xf0] }
 0x158   :  { %1157 = vmatpush.bf16.msrb.mxu0 %v1604_v30 }
 0x187   :  { %v693_v32 = vpop.f32.mrf.mxu0  ;;  %v707_v33 = vpop.f32.mrf.mxu1 }
 0x188   :  { %v708_v29 = vadd.f32 %v707_v33, %v693_v32  ;;  %v1591_v32 = vld [vmem:[#allocation11 + $0x30] sm:$0xf]  ;;  %v1728_v33 = vld [vmem:[#allocation11 + $0x34] sm:$0xf0] }
 0x18a   :  { %v2030_v35 = vadd.f32 %v708_v29, %v224_v34  ;;  %v1592_v34 = vor.u32 %v1728_v33, %v1591_v32  ;;  %v1727_v29 = vld [vmem:[#allocation11 + $0x34] sm:$0xf] }
 0x18c   :  { %1144 = vmatpush.bf16.msra.mxu3 %v1592_v34 }
 0x18e   :  { %v721_v37 = vpop.f32.mrf.mxu2  ;;  %v735_v39 = vpop.f32.mrf.mxu3 }
 0x18f   :  { %v736_v41 = vadd.f32 %v735_v39, %v721_v37  ;;  %v695_v42 = vpop.f32.mrf.mxu0  ;;  %v709_v44 = vpop.f32.mrf.mxu1 }
 0x190   :  { %v710_v46 = vadd.f32 %v709_v44, %v695_v42  ;;  %v1583_v44 = vld [vmem:[#allocation11 + $0x20] sm:$0xf] }
 0x191   :  { %v2032_v47 = vadd.f32 %v736_v41, %v238_v40  ;;  %v1596_v40 = vor.u32 %v1727_v29, %v1593_v36 }
 0x192   :  { %v2034_v48 = vadd.f32 %v710_v46, %v226_v45  ;;  %v1726_v45 = vld [vmem:[#allocation11 + $0x24] sm:$0xf0] }
 0x193   :  { %1158 = vmatpush.bf16.msrb.mxu0 %v1596_v40  ;;  %v1584_v46 = vor.u32 %v1726_v45, %v1583_v44 }
 0x195   :  { %1145 = vmatpush.bf16.msra.mxu3 %v1584_v46 }
 0x196   :  { %v723_v49 = vpop.f32.mrf.mxu2  ;;  %v737_v50 = vpop.f32.mrf.mxu3 }
 0x197   :  { %v738_v52 = vadd.f32 %v737_v50, %v723_v49  ;;  %v965_v53 = vpop.f32.mrf.mxu0  ;;  %v979_v54 = vpop.f32.mrf.mxu1  ;;  %v1725_v49 = vld [vmem:[#allocation11 + $0x24] sm:$0xf]  ;;  %v1585_v50 = vld [vmem:[#allocation11 + $0x28] sm:$0xf0] }
 0x198   :  { %v980_v2 = vadd.f32 %v979_v54, %v965_v53  ;;  %v1588_v53 = vor.u32 %v1725_v49, %v1585_v50 }
 0x199   :  { %v2036_v55 = vadd.f32 %v738_v52, %v240_v51  ;;  %1146 = vmatpush.bf16.msra.mxu3 %v1576_v59 }
 0x19a   :  { %1159 = vmatpush.bf16.msrb.mxu0 %v1588_v53 }
 0x19d   :  { %1147 = vmatpush.bf16.msra.mxu3 %v1568_v5 }
 0x19e   :  { %v993_v56 = vpop.f32.mrf.mxu2 }
 0x19f   :  { %v967_v63 = vpop.f32.mrf.mxu0  ;;  %v981_v0 = vpop.f32.mrf.mxu1  ;;  %v2038_v7 = vadd.f32 %v993_v56, %v980_v2 }
 0x1a0   :  { %v982_v8 = vadd.f32 %v981_v0, %v967_v63  ;;  %v1580_v0 = vor.u32 %v1723_v60, %v1577_v18 }
 0x1a1   :  { %v1006_v15 = vmul.f32 %v2038_v7, %v2038_v7 }
 0x1a2   :  { %1160 = vmatpush.bf16.msrb.mxu0 %v1580_v0 }
 0x1a6   :  { %v995_v10 = vpop.f32.mrf.mxu2  ;;  %1161 = vmatpush.bf16.msrb.mxu0 %v1572_v9 }
 0x1a7   :  { %v2040_v11 = vadd.f32 %v995_v10, %v982_v8 }
 0x1a9   :  { %v998_v38 = vadd.f32 %v2040_v11, %v2038_v7  ;;  %v1007_v16 = vmul.f32 %v2040_v11, %v2040_v11 }
 0x1ab   :  { %v999_v19 = vrot.slane %v998_v38, 4  ;;  %v1008_v20 = vadd.f32 %v1007_v16, %v1006_v15  ;;  %v1019_v15 = vld [vmem:[#allocation9 + $0x4] sm:$0x1] }
 0x1ad   :  { %v1000_v27 = vadd.f32 %v999_v19, %v998_v38  ;;  %v1009_v28 = vrot.slane %v1008_v20, 4  ;;  %v1020_v19 = vld [vmem:[#allocation9 + $0x5] sm:$0x1] }
 0x1af   :  { %v1001_v31 = vrot.slane %v1000_v27, 2  ;;  %v1010_v25 = vadd.f32 %v1009_v28, %v1008_v20 }
 0x1b1   :  { %v1002_v37 = vadd.f32 %v1001_v31, %v1000_v27  ;;  %v1011_v39 = vrot.slane %v1010_v25, 2 }
 0x1b3   :  { %v1003_v41 = vrot.slane %v1002_v37, 1  ;;  %v1012_v42 = vadd.f32 %v1011_v39, %v1010_v25 }
 0x1b5   :  { %v1004_v51 = vadd.f32 %v1003_v41, %v1002_v37  ;;  %v1013_v52 = vrot.slane %v1012_v42, 1 }
 0x1b7   :  { %v1005_v54 = vmul.f32 0.0625, %v1004_v51  ;;  %v1014_v56 = vadd.f32 %v1013_v52, %v1012_v42 }
 0x1b9   :  { %v1015_v62 = vmul.f32 0.0625, %v1014_v56  ;;  %v1016_v63 = vmul.f32 %v1005_v54, %v1005_v54 }
 0x1bb   :  { %v1017_v2 = vsub.f32 %v1015_v62, %v1016_v63 }
 0x1bd   :  { %v1018_v8 = vmax.f32 %v1017_v2, 0.0 }
 0x1bf   :  { %v1021_v10 = vadd.f32 1e-05, %v1018_v8 }
 0x1c1   :  { %1753 = vrsqrt.f32 %v1021_v10  ;;  %vm1028_vm8 = vweird.f32 %v1021_v10 }
 0x1c7   :  { %v1754_v43 = vpop.eup %1753 }
 0x1c8   :  { %v1023_v13 = vmul.f32 %v1754_v43, %v1021_v10  ;;  %vm1029_vm7 = vweird.f32 %v1754_v43 }
 0x1c9   :  { %vm1030_vm9 = vmor %vm1028_vm8, %vm1029_vm7 }
 0x1ca   :  { %v1024_v61 = vmul.f32 %v1754_v43, %v1023_v13 }
 0x1cc   :  { %v1025_v14 = vmul.f32 0.5, %v1024_v61 }
 0x1ce   :  { %v1026_v1 = vsub.f32 1.5, %v1025_v14 }
 0x1d0   :  { %v1027_v38 = vmul.f32 %v1754_v43, %v1026_v1 }
 0x1d2   :  { %v1031_v16 = vsel %vm1030_vm9, %v1754_v43, %v1027_v38 }
 0x1d3   :  { %v1032_v17 = vmul.f32 %v1031_v16, %v1019_v15 }
 0x1d5   :  { %v1033_v20 = vmul.f32 %v1032_v17, %v1005_v54  ;;  %v1035_v21 = vperm.slane %v1032_v17, 0 }
 0x1d7   :  { %v1034_v22 = vsub.f32 %v1020_v19, %v1033_v20  ;;  %v1036_v23 = vmul.f32 %v1035_v21, %v2038_v7  ;;  %v1037_v24 = vmul.f32 %v1035_v21, %v2040_v11 }
 0x1d9   :  { %v1038_v26 = vperm.slane %v1034_v22, 0 }
 0x1db   :  { %v1040_v27 = vadd.f32 %v1038_v26, %v1037_v24  ;;  %v1039_v28 = vadd.f32 %v1038_v26, %v1036_v23 }
 0x1dd   :  { %v1042_v30 = vmax.f32 %v1040_v27, 0.0  ;;  %v1041_v31 = vmax.f32 %v1039_v28, 0.0 }
 0x1df   :  { %v1043_v25 = vpack.c.bf16 %v1042_v30, %v1041_v31 }
 0x1e1   :  { %1148 = vmatmul.bf16.vlgmr.msra.gmra.mxu3 %v1043_v25  ;;  %1162 = vmatmul.bf16.vlgmr.msrb.gmra.mxu0 %v1043_v25 }
 0x25e   :  { %v1163_v32 = vpop.f32.mrf.mxu0 }
 0x25f   :  { %v1169_v33 = vadd.f32 %v1163_v32, %v2032_v47 }
 0x261   :  { %1173 = vst [vmem:[#allocation12 + $0x8] sm:$0xff] %v1169_v33 }
 0x264   :  { %v1149_v34 = vpop.f32.mrf.mxu3 }
 0x265   :  { %v1168_v29 = vadd.f32 %v1149_v34, %v2030_v35 }
 0x266   :  { %v1165_v36 = vpop.f32.mrf.mxu0 }
 0x267   :  { %1172 = vst [vmem:[#allocation12] sm:$0xff] %v1168_v29  ;;  %v1171_v7 = vadd.f32 %v1165_v36, %v2036_v55 }
 0x269   :  { %1175 = vst [vmem:[#allocation12 + $0x18] sm:$0xff] %v1171_v7 }
 0x26c   :  { %v1151_v11 = vpop.f32.mrf.mxu3 }
 0x26d   :  { %v1170_v47 = vadd.f32 %v1151_v11, %v2034_v48 }
 0x26f   :  { %1174 = vst [vmem:[#allocation12 + $0x10] sm:$0xff] %v1170_v47 }
 0x270   :  { %1188 = dma.vmem_to_hbm [thread:$0]  %s1181_s23, 512, %s1183_s26, [#allocation5], %s1917_s27, %s1917_s27, %s1918_s28  }
 0x271   :  { %1905 = dma.done.wait [#allocation5], 512  }
 0x272   :  { %1906 = vsyncadd [#allocation5], 4294966784 }
 0x273   :  { %1193 = vsyncpa [#allocation4], 1 }
 0x274   :  { %1194 = vsyncpa [#allocation7], 1 }
 0x275   :  { %1195 = vsyncpa [#allocation10], 1 }
 0x276   :  { %1196 = vsyncpa [#allocation5], 1 }

</bundles_post_ra>
